<compile_context>
chip_gen: v7x
topology: tpu7x:2x2x1
jax: 0.10.0
libtpu: 0.0.40
codegen_flags: <defaults>
</compile_context>

<pallas_src>
import jax
import jax.numpy as jnp
from jax import lax
from jax.experimental import pallas as pl
from jax.experimental.pallas import tpu as pltpu


def _lstm_step_kernel(inp_ref, x_ref, wih_ref, whh_ref, b_ref, out_ref,
                      h_ref, c_ref):
    """One (batch_tile, time_step) grid point of the recurrent LSTM."""
    t = pl.program_id(1)

    @pl.when(t == 0)
    def _():
        h_ref[...] = jnp.zeros_like(h_ref)
        c_ref[...] = jnp.zeros_like(c_ref)

    H = h_ref.shape[-1]

    # gates: (Bt, 4H), PyTorch gate order [i, f, g, o]
    gates = (
        jnp.dot(x_ref[...], wih_ref[...], preferred_element_type=jnp.float32)
        + jnp.dot(h_ref[...], whh_ref[...], preferred_element_type=jnp.float32)
        + b_ref[...]
    )
    i_g = jax.nn.sigmoid(gates[:, 0:H])
    f_g = jax.nn.sigmoid(gates[:, H:2 * H])
    g_g = jnp.tanh(gates[:, 2 * H:3 * H])
    o_g = jax.nn.sigmoid(gates[:, 3 * H:4 * H])

    c_new = f_g * c_ref[...] + i_g * g_g
    h_new = o_g * jnp.tanh(c_new)
    c_ref[...] = c_new
    h_ref[...] = h_new

    # residual: out_t = h_t + inp_t
    out_ref[...] = (h_new + inp_ref[...].astype(jnp.float32)).astype(out_ref.dtype)


def _pick_block_b(batch):
    """Batch tile: multiple of 8 dividing B (prefer >=2 tiles), else full B."""
    if batch % 8 != 0:
        return batch
    half = batch // 2
    for cand in (512, 256, 128, 64, 32, 16, 8):
        if cand <= half and batch % cand == 0:
            return cand
    return batch


def lstm_residual_pallas(inp, inp_dropout, w_ih, w_hh, b_ih, b_hh):
    """out[t] = LSTM(inp_dropout)[t] + inp[t]; seq-major (S, B, H)."""
    S, B, H_in = inp_dropout.shape
    H = w_hh.shape[1]
    assert w_ih.shape == (4 * H, H_in)
    assert inp.shape == (S, B, H), "residual requires input size == hidden size"

    # Kernel-friendly layouts: (in, 4H) weights so each step is
    # (Bt, in) @ (in, 4H), plus one combined (1, 4H) bias row.
    wih_t = w_ih.T.astype(jnp.float32)                       # (H_in, 4H)
    whh_t = w_hh.T.astype(jnp.float32)                       # (H,    4H)
    bias = (b_ih + b_hh).astype(jnp.float32).reshape(1, 4 * H)

    block_b = _pick_block_b(B)
    nb = B // block_b

    return pl.pallas_call(
        _lstm_step_kernel,
        out_shape=jax.ShapeDtypeStruct((S, B, H), inp.dtype),
        grid_spec=pltpu.PrefetchScalarGridSpec(
            num_scalar_prefetch=0,
            grid=(nb, S),
            in_specs=[
                pl.BlockSpec((None, block_b, H), lambda b, t: (t, b, 0)),     # inp (residual)
                pl.BlockSpec((None, block_b, H_in), lambda b, t: (t, b, 0)),  # LSTM input
                pl.BlockSpec((H_in, 4 * H), lambda b, t: (0, 0)),             # W_ih^T (resident)
                pl.BlockSpec((H, 4 * H), lambda b, t: (0, 0)),                # W_hh^T (resident)
                pl.BlockSpec((1, 4 * H), lambda b, t: (0, 0)),                # bias   (resident)
            ],
            out_specs=pl.BlockSpec((None, block_b, H), lambda b, t: (t, b, 0)),
            scratch_shapes=[
                pltpu.VMEM((block_b, H), jnp.float32),   # h carry
                pltpu.VMEM((block_b, H), jnp.float32),   # c carry
            ],
        ),
        compiler_params=pltpu.CompilerParams(
            dimension_semantics=("parallel", "arbitrary"),
        ),
    )(inp, inp_dropout, wih_t, whh_t, bias)


def lstm1_forward(inputs, params):
    """bi=False, residual=True path of lstm1.forward."""
    inp, inp_dropout, src_length, tgt_input = inputs
    w_ih, w_hh, b_ih, b_hh = params
    out = lstm_residual_pallas(inp, inp_dropout, w_ih, w_hh, b_ih, b_hh)
    # TODO(synk): bi=True branch (pack_padded_sequence + bidirectional LSTM) not implemented.
    return (out, src_length, tgt_input)


def _lstm_residual_ref(inp, inp_dropout, w_ih, w_hh, b_ih, b_hh):
    """Pure-JAX reference (lax.scan) for correctness checking."""
    S, B, _ = inp_dropout.shape
    H = w_hh.shape[1]

    def step(carry, x_t):
        h, c = carry
        gates = x_t @ w_ih.T + h @ w_hh.T + b_ih + b_hh
        i = jax.nn.sigmoid(gates[:, 0:H])
        f = jax.nn.sigmoid(gates[:, H:2 * H])
        g = jnp.tanh(gates[:, 2 * H:3 * H])
        o = jax.nn.sigmoid(gates[:, 3 * H:4 * H])
        c = f * c + i * g
        h = o * jnp.tanh(c)
        return (h, c), h

    init = (jnp.zeros((B, H), jnp.float32), jnp.zeros((B, H), jnp.float32))
    _, hs = lax.scan(step, init, inp_dropout)
    return hs + inp


if __name__ == "__main__":
    key = jax.random.PRNGKey(0)
    ks = jax.random.split(key, 6)

    # Small shapes consistent with the module (seq-major LSTM, size == hidden).
    S, B, H = 8, 2, 32   # real GNMT: S~50, B~128, H=1024

    inp = jax.random.normal(ks[0], (S, B, H), dtype=jnp.float32)
    inp_dropout = jax.random.normal(ks[1], (S, B, H), dtype=jnp.float32)
    src_length = jnp.full((B,), S, dtype=jnp.int32)
    tgt_input = jax.random.normal(ks[2], (S, B, H), dtype=jnp.float32)

    # init_lstm_(layer, 0.1): uniform(-0.1, 0.1) weights/biases.
    bound = 0.1
    w_ih = jax.random.uniform(ks[3], (4 * H, H), jnp.float32, -bound, bound)
    w_hh = jax.random.uniform(ks[4], (4 * H, H), jnp.float32, -bound, bound)
    b_ih = jax.random.uniform(ks[5], (4 * H,), jnp.float32, -bound, bound)
    b_hh = jnp.zeros((4 * H,), jnp.float32)

    out, out_len, out_tgt = lstm1_forward(
        (inp, inp_dropout, src_length, tgt_input), (w_ih, w_hh, b_ih, b_hh))
    jax.block_until_ready(out)

    ref = _lstm_residual_ref(inp, inp_dropout, w_ih, w_hh, b_ih, b_hh)
    assert out.shape == (S, B, H)
    max_err = float(jnp.max(jnp.abs(out - ref)))
    assert jnp.allclose(out, ref, rtol=1e-5, atol=1e-5), max_err
    assert out_len is src_length and out_tgt is tgt_input

    print("KERNEL_OK")
</pallas_src>

<mosaic_0001>
module attributes {stable_mosaic.version = 11 : i64} {
  func.func @_lstm_step_kernel(%arg0: i32, %arg1: i32, %arg2: memref<1x2x32xf32, #tpu.memory_space<vmem>>, %arg3: memref<1x2x32xf32, #tpu.memory_space<vmem>>, %arg4: memref<32x128xf32, #tpu.memory_space<vmem>>, %arg5: memref<32x128xf32, #tpu.memory_space<vmem>>, %arg6: memref<1x128xf32, #tpu.memory_space<vmem>>, %arg7: memref<1x2x32xf32, #tpu.memory_space<vmem>>, %arg8: memref<2x32xf32, #tpu.memory_space<vmem>>, %arg9: memref<2x32xf32, #tpu.memory_space<vmem>>) attributes {dimension_semantics = [#tpu.dimension_semantics<parallel>, #tpu.dimension_semantics<arbitrary>], iteration_bounds = array<i64: 1, 8>, scalar_prefetch = 0 : i64, scratch_operands = 2 : i64, tpu.core_type = #tpu.core_type<tc>, window_params = [{transform_indices = @transform_0, window_bounds = array<i64: 1, 2, 32>}, {transform_indices = @transform_1, window_bounds = array<i64: 1, 2, 32>}, {pipeline_mode = #tpu.pipeline_mode<synchronous>, transform_indices = @transform_2, window_bounds = array<i64: 32, 128>}, {pipeline_mode = #tpu.pipeline_mode<synchronous>, transform_indices = @transform_3, window_bounds = array<i64: 32, 128>}, {pipeline_mode = #tpu.pipeline_mode<synchronous>, transform_indices = @transform_4, window_bounds = array<i64: 1, 128>}, {transform_indices = @transform_5, window_bounds = array<i64: 1, 2, 32>}]} {
    %c0_i32 = arith.constant 0 : i32
    %0 = arith.cmpi eq, %arg1, %c0_i32 : i32
    %1 = arith.extui %0 : i1 to i32
    %c0_i32_0 = arith.constant 0 : i32
    %2 = arith.cmpi ne, %1, %c0_i32_0 : i32
    scf.if %2 {
      %cst_27 = arith.constant 0.000000e+00 : f32
      %48 = vector.broadcast %cst_27 : f32 to vector<2x32xf32>
      %c0_28 = arith.constant 0 : index
      %c0_29 = arith.constant 0 : index
      %49 = vector.load %arg8[%c0_28, %c0_29] : memref<2x32xf32, #tpu.memory_space<vmem>>, vector<2x32xf32>
      tpu.vector_store %arg8[%c0_28, %c0_29], %48 {strides = array<i32>} : memref<2x32xf32, #tpu.memory_space<vmem>>, vector<2x32xf32>,
      %cst_30 = arith.constant 0.000000e+00 : f32
      %50 = vector.broadcast %cst_30 : f32 to vector<2x32xf32>
      %c0_31 = arith.constant 0 : index
      %c0_32 = arith.constant 0 : index
      %51 = vector.load %arg9[%c0_31, %c0_32] : memref<2x32xf32, #tpu.memory_space<vmem>>, vector<2x32xf32>
      tpu.vector_store %arg9[%c0_31, %c0_32], %50 {strides = array<i32>} : memref<2x32xf32, #tpu.memory_space<vmem>>, vector<2x32xf32>,
    } else {
    }
    %c0 = arith.constant 0 : index
    %c0_1 = arith.constant 0 : index
    %c0_2 = arith.constant 0 : index
    %3 = vector.load %arg3[%c0, %c0_1, %c0_2] : memref<1x2x32xf32, #tpu.memory_space<vmem>>, vector<1x2x32xf32>
    %4 = vector.shape_cast %3 : vector<1x2x32xf32> to vector<2x32xf32>
    %c0_3 = arith.constant 0 : index
    %c0_4 = arith.constant 0 : index
    %5 = vector.load %arg4[%c0_3, %c0_4] : memref<32x128xf32, #tpu.memory_space<vmem>>, vector<32x128xf32>
    %cst = arith.constant dense<0.000000e+00> : vector<2x128xf32>
    %6 = tpu.matmul %4, %5, %cst {dimension_numbers = #tpu.dot_dimension_numbers<[1], [0], [0], [1], [0, 0, 1, 1], [], []>} : vector<2x32xf32>, vector<32x128xf32>, vector<2x128xf32> -> vector<2x128xf32>
    %c0_5 = arith.constant 0 : index
    %c0_6 = arith.constant 0 : index
    %7 = vector.load %arg8[%c0_5, %c0_6] : memref<2x32xf32, #tpu.memory_space<vmem>>, vector<2x32xf32>
    %c0_7 = arith.constant 0 : index
    %c0_8 = arith.constant 0 : index
    %8 = vector.load %arg5[%c0_7, %c0_8] : memref<32x128xf32, #tpu.memory_space<vmem>>, vector<32x128xf32>
    %cst_9 = arith.constant dense<0.000000e+00> : vector<2x128xf32>
    %9 = tpu.matmul %7, %8, %cst_9 {dimension_numbers = #tpu.dot_dimension_numbers<[1], [0], [0], [1], [0, 0, 1, 1], [], []>} : vector<2x32xf32>, vector<32x128xf32>, vector<2x128xf32> -> vector<2x128xf32>
    %10 = arith.addf %6, %9 : vector<2x128xf32>
    %c0_10 = arith.constant 0 : index
    %c0_11 = arith.constant 0 : index
    %11 = vector.load %arg6[%c0_10, %c0_11] : memref<1x128xf32, #tpu.memory_space<vmem>>, vector<1x128xf32>
    %12 = vector.broadcast %11 : vector<1x128xf32> to vector<2x128xf32>
    %13 = arith.addf %10, %12 : vector<2x128xf32>
    %14 = vector.extract_strided_slice %13 {offsets = [0, 0], sizes = [2, 32], strides = [1, 1]} : vector<2x128xf32> to vector<2x32xf32>
    %15 = arith.negf %14 : vector<2x32xf32>
    %16 = math.exp %15 : vector<2x32xf32>
    %cst_12 = arith.constant 1.000000e+00 : f32
    %17 = vector.broadcast %cst_12 : f32 to vector<2x32xf32>
    %18 = arith.addf %17, %16 : vector<2x32xf32>
    %19 = arith.divf %17, %18 : vector<2x32xf32>
    %20 = vector.extract_strided_slice %13 {offsets = [0, 32], sizes = [2, 32], strides = [1, 1]} : vector<2x128xf32> to vector<2x32xf32>
    %21 = arith.negf %20 : vector<2x32xf32>
    %22 = math.exp %21 : vector<2x32xf32>
    %cst_13 = arith.constant 1.000000e+00 : f32
    %23 = vector.broadcast %cst_13 : f32 to vector<2x32xf32>
    %24 = arith.addf %23, %22 : vector<2x32xf32>
    %25 = arith.divf %23, %24 : vector<2x32xf32>
    %26 = vector.extract_strided_slice %13 {offsets = [0, 64], sizes = [2, 32], strides = [1, 1]} : vector<2x128xf32> to vector<2x32xf32>
    %27 = math.tanh %26 : vector<2x32xf32>
    %28 = vector.extract_strided_slice %13 {offsets = [0, 96], sizes = [2, 32], strides = [1, 1]} : vector<2x128xf32> to vector<2x32xf32>
    %29 = arith.negf %28 : vector<2x32xf32>
    %30 = math.exp %29 : vector<2x32xf32>
    %cst_14 = arith.constant 1.000000e+00 : f32
    %31 = vector.broadcast %cst_14 : f32 to vector<2x32xf32>
    %32 = arith.addf %31, %30 : vector<2x32xf32>
    %33 = arith.divf %31, %32 : vector<2x32xf32>
    %c0_15 = arith.constant 0 : index
    %c0_16 = arith.constant 0 : index
    %34 = vector.load %arg9[%c0_15, %c0_16] : memref<2x32xf32, #tpu.memory_space<vmem>>, vector<2x32xf32>
    %35 = arith.mulf %25, %34 : vector<2x32xf32>
    %36 = arith.mulf %19, %27 : vector<2x32xf32>
    %37 = arith.addf %35, %36 : vector<2x32xf32>
    %38 = math.tanh %37 : vector<2x32xf32>
    %39 = arith.mulf %33, %38 : vector<2x32xf32>
    %c0_17 = arith.constant 0 : index
    %c0_18 = arith.constant 0 : index
    %40 = vector.load %arg9[%c0_17, %c0_18] : memref<2x32xf32, #tpu.memory_space<vmem>>, vector<2x32xf32>
    tpu.vector_store %arg9[%c0_17, %c0_18], %37 {strides = array<i32>} : memref<2x32xf32, #tpu.memory_space<vmem>>, vector<2x32xf32>,
    %c0_19 = arith.constant 0 : index
    %c0_20 = arith.constant 0 : index
    %41 = vector.load %arg8[%c0_19, %c0_20] : memref<2x32xf32, #tpu.memory_space<vmem>>, vector<2x32xf32>
    tpu.vector_store %arg8[%c0_19, %c0_20], %39 {strides = array<i32>} : memref<2x32xf32, #tpu.memory_space<vmem>>, vector<2x32xf32>,
    %c0_21 = arith.constant 0 : index
    %c0_22 = arith.constant 0 : index
    %c0_23 = arith.constant 0 : index
    %42 = vector.load %arg2[%c0_21, %c0_22, %c0_23] : memref<1x2x32xf32, #tpu.memory_space<vmem>>, vector<1x2x32xf32>
    %43 = vector.shape_cast %42 : vector<1x2x32xf32> to vector<2x32xf32>
    %44 = arith.addf %39, %43 : vector<2x32xf32>
    %c0_24 = arith.constant 0 : index
    %c0_25 = arith.constant 0 : index
    %c0_26 = arith.constant 0 : index
    %45 = vector.load %arg7[%c0_24, %c0_25, %c0_26] : memref<1x2x32xf32, #tpu.memory_space<vmem>>, vector<1x2x32xf32>
    %46 = vector.shape_cast %45 : vector<1x2x32xf32> to vector<2x32xf32>
    %47 = vector.shape_cast %44 : vector<2x32xf32> to vector<1x2x32xf32>
    tpu.vector_store %arg7[%c0_24, %c0_25, %c0_26], %47 {strides = array<i32>} : memref<1x2x32xf32, #tpu.memory_space<vmem>>, vector<1x2x32xf32>,
    return
  }
  func.func @transform_0(%arg0: i32, %arg1: i32) -> (i32, i32, i32) {
    %c0_i32 = arith.constant 0 : i32
    %c0_i32_0 = arith.constant 0 : i32
    return %arg1, %arg0, %c0_i32 : i32, i32, i32
  }
  func.func @transform_1(%arg0: i32, %arg1: i32) -> (i32, i32, i32) {
    %c0_i32 = arith.constant 0 : i32
    %c0_i32_0 = arith.constant 0 : i32
    return %arg1, %arg0, %c0_i32 : i32, i32, i32
  }
  func.func @transform_2(%arg0: i32, %arg1: i32) -> (i32, i32) {
    %c0_i32 = arith.constant 0 : i32
    %c0_i32_0 = arith.constant 0 : i32
    %c0_i32_1 = arith.constant 0 : i32
    return %c0_i32, %c0_i32_0 : i32, i32
  }
  func.func @transform_3(%arg0: i32, %arg1: i32) -> (i32, i32) {
    %c0_i32 = arith.constant 0 : i32
    %c0_i32_0 = arith.constant 0 : i32
    %c0_i32_1 = arith.constant 0 : i32
    return %c0_i32, %c0_i32_0 : i32, i32
  }
  func.func @transform_4(%arg0: i32, %arg1: i32) -> (i32, i32) {
    %c0_i32 = arith.constant 0 : i32
    %c0_i32_0 = arith.constant 0 : i32
    %c0_i32_1 = arith.constant 0 : i32
    return %c0_i32, %c0_i32_0 : i32, i32
  }
  func.func @transform_5(%arg0: i32, %arg1: i32) -> (i32, i32, i32) {
    %c0_i32 = arith.constant 0 : i32
    %c0_i32_0 = arith.constant 0 : i32
    return %arg1, %arg0, %c0_i32 : i32, i32, i32
  }
}

</mosaic_0001>

<bundles_post_ra>
// kernel: tpu_custom_call.1
= control target key start
LH: loop header
LB: loop body
LE: loop exit
PB: predicated region body
PF: predicated region fallthrough
CT: control target
= control target key end

     0   :  { %s1412_s0 = inlined_call_operand.hbm [shape: f32[8,2,32], index: 0, kind: input, shape index: {}]   ;;  %s1413_s1 = inlined_call_operand.hbm [shape: f32[8,2,32], index: 1, kind: input, shape index: {}]   ;;  %s1414_s2 = inlined_call_operand.hbm [shape: f32[32,128], index: 2, kind: input, shape index: {}]   ;;  %s1415_s3 = inlined_call_operand.hbm [shape: f32[32,128], index: 3, kind: input, shape index: {}]   ;;  %s1416_s4 = inlined_call_operand.vmem [shape: f32[1,128], index: 4, kind: input, shape index: {}]   ;;  %s1417_s5 = inlined_call_operand.hbm [shape: f32[8,2,32], index: 5, kind: output, shape index: {}]  }
   0x1   :  { %1424 = sst [smem:[#allocation20_spill]] %s1414_s2 }
   0x2   :  { %1425 = sst [smem:[#allocation21_spill]] %s1415_s3 }
   0x3   :  { %10 = vsyncpa [#allocation5], 0 }
   0x4   :  { %12 = vsyncpa [#allocation5 + $0x1], 0 }
   0x5   :  { %13 = vsyncpa [#allocation8], 0 }
   0x6   :  { %15 = vsyncpa [#allocation8 + $0x1], 0 }
   0x7   :  { %16 = vsyncpa [#allocation11], 0 }
   0x8   :  { %17 = vsyncpa [#allocation6], 0 }
   0x9   :  { %19 = vsyncpa [#allocation6 + $0x1], 0  ;;  %s1117_s18 = smov 0   ;;  %s1119_s19 = smov 0  }
   0xa   :  { %s1121_s20 = smov 0   ;;  %s1123_s21 = smov 0  }
   0xb   :  { %s1125_s22 = smov 0   ;;  %s1127_s23 = smov 0  }
   0xc LB: > { %1426 = sst [smem:[#allocation18_spill]] %s1067_s22  ;;  %s1148_s24 = sadd.s32 4294967295, %s1071_s23   ;;  %s1071_s23 = sphi %s1127_s23, %s25_s23   ;;  %s1067_s22 = sphi %s1125_s22, %s1446_s22   ;;  %s1063_s21 = sphi %s1123_s21, %s1445_s21   ;;  %s1059_s20 = sphi %s1121_s20, %s1449_s20   ;;  %s1055_s19 = sphi %s1119_s19, %s1448_s19   ;;  %s1051_s18 = sphi %s1117_s18, %s1447_s18  }
   0xd   : > { %s688_s25 = sadd.s32 4294967294, %s1071_s23   ;;  %p59_p0 = scmp.ne.s32.totalorder %s1055_s19, %s1051_s18 }
   0xe   : > { %p1418_p1 = scmp.eq.s32.totalorder %s1148_s24, 0  ;;  %p182_p3 = scmp.eq.s32.totalorder %s688_s25, 7 }
   0xf   : > { %p689_p5 = scmp.ge.s32.totalorder %s1071_s23, 1  ;;  %p189_p7 = scmp.lt.s32.totalorder %s1071_s23, 9 }
  0x10   : > { %p1157_p4 = por %p1418_p1, %p59_p0  ;;  %p1162_p6 = por %p182_p3, %p59_p0 }
  0x11   : > { %p1167_p8 = pnand %p689_p5, %p189_p7  ;;  %s1073_s29 = smov [#allocation9]  }
  0x12   : > { %s1427_s26 = scalar_select %p1157_p4, 1, 0 }
  0x13   : > { %s1428_s27 = scalar_select %p1162_p6, 1, 0 }
  0x14   : > { %s1429_s28 = scalar_select %p1167_p8, 1, 0 }
  0x15   : > { %s201_s30 = sshll.u32 %s1073_s29, 4  ;;  %p770_p9 = pneg %p1167_p8  ;;  %s202_s30 = int_to_ptr.vmem [resolvable:$true] %s201_s30 }
  0x16   : > { %s1074_s7 = smov [#allocation10]   ;;  %s1431_s2 = sld [smem:[#allocation20_spill]] }
  0x17   : > { %p1175_p10 = pnand %p770_p9, %p1418_p1  ;;  %s214_s8 = sshll.u32 %s1074_s7, 4  ;;  %s1179_s8 = int_to_ptr.vmem [resolvable:$true] %s214_s8 }
  0x19   : > { %p863_p12 = pneg %p1175_p10 }
  0x1c   : > { %s861_s11 = scalar_lea.hbm %s1431_s2, 512 }
  0x1d   : > { %p862_p11 = scmp.ne.s32.totalorder %s1431_s2, %s861_s11  ;;  %p868_p3 = scmp.lt.u32.totalorder %s861_s11, %s1431_s2 }
  0x1f   : > { %p864_p13 = pnand %p863_p12, %p862_p11 }
  0x21   : > { %p865_p0 = pneg %p864_p13 }
  0x23   : > { %p870_p5 = pnand %p868_p3, %p865_p0 }
  0x25   : > { %873 = shalt.err (!%p870_p5)
}
  0x26   : > { %s874_s16 = scalar_lea.vmem %s202_s30, 512  ;;  %p882_p2 = scmp.lt.s32.totalorder %s202_s30, %s202_s30 }
  0x27   : > { %p875_p7 = scmp.ne.s32.totalorder %s202_s30, %s874_s16  ;;  %p883_p6 = scmp.lt.s32.totalorder %s874_s16, %s874_s16 }
  0x29   : > { %p877_p9 = pnand %p875_p7, %p863_p12  ;;  %p884_p4 = por %p883_p6, %p882_p2 }
  0x2b   : > { %p878_p1 = pneg %p877_p9 }
  0x2d   : > { %p885_p8 = pnand %p884_p4, %p878_p1 }
  0x2f   : > { %888 = shalt.err (!%p885_p8)
}
  0x30   : > { %s1075_s17 = smov 128   ;;  %s1076_s25 = smov 8  }
  0x31   : > { %773 = dma.hbm_to_vmem [thread:$0]  (!%p1175_p10), %s1431_s2, 512, %s202_s30, [#allocation8], %s1075_s17, %s1075_s17, %s1076_s25  }
  0x32   : > { %s1432_s3 = sld [smem:[#allocation21_spill]] }
  0x38   : > { %s889_s11 = scalar_lea.hbm %s1432_s3, 512 }
  0x39   : > { %p890_p11 = scmp.ne.s32.totalorder %s1432_s3, %s889_s11  ;;  %p896_p4 = scmp.lt.u32.totalorder %s889_s11, %s1432_s3 }
  0x3b   : > { %p892_p1 = pnand %p890_p11, %p863_p12 }
  0x3d   : > { %p893_p2 = pneg %p892_p1 }
  0x3f   : > { %p898_p6 = pnand %p896_p4, %p893_p2 }
  0x41   : > { %901 = shalt.err (!%p898_p6)
}
  0x42   : > { %s902_s30 = scalar_lea.vmem %s1179_s8, 512  ;;  %p910_p3 = scmp.lt.s32.totalorder %s1179_s8, %s1179_s8 }
  0x43   : > { %p903_p8 = scmp.ne.s32.totalorder %s1179_s8, %s902_s30  ;;  %p911_p5 = scmp.lt.s32.totalorder %s902_s30, %s902_s30 }
  0x45   : > { %p905_p13 = pnand %p903_p8, %p863_p12  ;;  %p912_p7 = por %p911_p5, %p910_p3 }
  0x47   : > { %p906_p0 = pneg %p905_p13 }
  0x49   : > { %p913_p9 = pnand %p912_p7, %p906_p0 }
  0x4b   : > { %916 = shalt.err (!%p913_p9)
}
  0x4c   : > { %776 = dma.hbm_to_vmem [thread:$0]  (!%p1175_p10), %s1432_s3, 512, %s1179_s8, [#allocation11], %s1075_s17, %s1075_s17, %s1076_s25  }
  0x4d   : > { %s34_s7 = sadd.s32 1, %s1067_s22  ;;  %s46_s9 = sadd.s32 1, %s1059_s20 }
  0x4e   : > { %p35_p12 = scmp.ge.s32.totalorder %s34_s7, 8  ;;  %p53_p11 = scmp.ne.s32.totalorder %s1059_s20, %s1055_s19 }
  0x4f   : > { %p54_p1 = scmp.eq.s32.totalorder %s1071_s23, 0  ;;  %p790_p2 = scmp.lt.s32.totalorder %s1071_s23, 8 }
  0x50   : > { %s1451_s7 = smov (%p35_p12, %s34_s7), 0  ;;  %p1434_p6 = scmp.eq.s32.totalorder %s1148_s24, 7 }
  0x51   : > { %1433 = sst [smem:[#allocation19_spill]] %s1451_s7  ;;  %p55_p4 = por %p54_p1, %p53_p11 }
  0x52   : > { %p1238_p8 = por %p1434_p6, %p53_p11  ;;  %s41_s10 = ssub.s32 %s1067_s22, %s1451_s7 }
  0x53   : > { %s231_s11 = sand.u32 1, %s1059_s20   ;;  %p44_p13 = scmp.eq.s32.totalorder %s41_s10, 0 }
  0x54   : > { %s1435_s6 = scalar_select %p1238_p8, 1, 0 }
  0x55   : > { %s1245_s8 = sshll.u32 %s231_s11, 1  ;;  %s694_s17 = sshll.u32 %s1067_s22, 5 }
  0x56   : > { %s1249_s25 = scalar_select %p44_p13, %s1059_s20, %s46_s9  }
  0x57   : > { %s1254_s14 = scalar_lea.hbm %s1412_s0, %s694_s17  ;;  %s235_s15 = scalar_lea.vmem [#allocation4], %s1245_s8 }
  0x58   : > { %s243_s30 = sshll.u32 %s235_s15, 4  ;;  %p1259_p10 = pnand %p790_p2, %p55_p4  ;;  %s1263_s30 = int_to_ptr.vmem [resolvable:$true] %s243_s30 }
  0x59   : > { %s1268_s10 = scalar_lea.hbm %s1413_s1, %s694_s17  ;;  %s232_s12 = scalar_lea.sflag [#allocation5], %s231_s11 }
  0x5a   : > { %s917_s13 = scalar_lea.hbm %s1254_s14, 32  ;;  %p919_p3 = pneg %p1259_p10 }
  0x5b   : > { %p918_p0 = scmp.ne.s32.totalorder %s1254_s14, %s917_s13  ;;  %s922_s3 = scalar_lea.hbm %s1412_s0, 256 }
  0x5c   : > { %p923_p9 = scmp.lt.u32.totalorder %s1254_s14, %s1412_s0  ;;  %p924_p12 = scmp.lt.u32.totalorder %s922_s3, %s917_s13 }
  0x5d   : > { %p920_p5 = pnand %p919_p3, %p918_p0  ;;  %p926_p1 = scmp.lt.u32.totalorder %s917_s13, %s1254_s14 }
  0x5e   : > { %p925_p11 = por %p924_p12, %p923_p9 }
  0x5f   : > { %p921_p7 = pneg %p920_p5 }
  0x60   : > { %p927_p2 = por %p926_p1, %p925_p11 }
  0x62   : > { %p928_p4 = pnand %p927_p2, %p921_p7 }
  0x64   : > { %931 = shalt.err (!%p928_p4)
}
  0x65   : > { %s932_s11 = scalar_lea.vmem %s1263_s30, 32  ;;  %s1077_s2 = smov [#allocation4]  }
  0x66   : > { %p933_p6 = scmp.ne.s32.totalorder %s1263_s30, %s932_s11  ;;  %s937_s17 = sshll.u32 %s1077_s2, 4  ;;  %s938_s17 = int_to_ptr.vmem [resolvable:$false] %s937_s17 }
  0x67   : > { %s939_s22 = scalar_lea.vmem %s938_s17, 64  ;;  %p940_p5 = scmp.lt.s32.totalorder %s1263_s30, %s938_s17 }
  0x68   : > { %p935_p13 = pnand %p933_p6, %p919_p3  ;;  %p941_p9 = scmp.lt.s32.totalorder %s939_s22, %s932_s11 }
  0x6a   : > { %p936_p0 = pneg %p935_p13  ;;  %p942_p12 = por %p941_p9, %p940_p5 }
  0x6c   : > { %p943_p11 = pnand %p942_p12, %p936_p0 }
  0x6e   : > { %946 = shalt.err (!%p943_p11)
}
  0x6f   : > { %780 = dma.hbm_to_vmem [thread:$0]  (!%p1259_p10), %s1254_s14, 32, %s1263_s30, %s232_s12  }
  0x70   : > { %s250_s3 = sand.u32 1, %s1071_s23   ;;  %s254_s7 = scalar_lea.vmem [#allocation7], %s1245_s8 }
  0x71   : > { %s262_s29 = sshll.u32 %s254_s7, 4  ;;  %s251_s9 = scalar_lea.sflag [#allocation8], %s250_s3  ;;  %s263_s29 = int_to_ptr.vmem [resolvable:$true] %s262_s29 }
  0x72   : > { %s947_s13 = scalar_lea.hbm %s1268_s10, 32  ;;  %s952_s2 = scalar_lea.hbm %s1413_s1, 256 }
  0x73   : > { %p948_p7 = scmp.ne.s32.totalorder %s1268_s10, %s947_s13  ;;  %p953_p4 = scmp.lt.u32.totalorder %s1268_s10, %s1413_s1 }
  0x74   : > { %p954_p6 = scmp.lt.u32.totalorder %s952_s2, %s947_s13  ;;  %p956_p0 = scmp.lt.u32.totalorder %s947_s13, %s1268_s10 }
  0x75   : > { %p950_p1 = pnand %p948_p7, %p919_p3 }
  0x76   : > { %p955_p13 = por %p954_p6, %p953_p4 }
  0x77   : > { %p951_p2 = pneg %p950_p1 }
  0x78   : > { %p957_p5 = por %p956_p0, %p955_p13 }
  0x7a   : > { %p958_p9 = pnand %p957_p5, %p951_p2 }
  0x7c   : > { %961 = shalt.err (!%p958_p9)
}
  0x7d   : > { %s962_s8 = scalar_lea.vmem %s263_s29, 32  ;;  %s1078_s14 = smov [#allocation7]  }
  0x7e   : > { %p963_p12 = scmp.ne.s32.totalorder %s263_s29, %s962_s8  ;;  %s967_s30 = sshll.u32 %s1078_s14, 4  ;;  %s968_s30 = int_to_ptr.vmem [resolvable:$false] %s967_s30 }
  0x7f   : > { %s969_s12 = scalar_lea.vmem %s968_s30, 64  ;;  %p970_p1 = scmp.lt.s32.totalorder %s263_s29, %s968_s30 }
  0x80   : > { %p965_p11 = pnand %p963_p12, %p919_p3  ;;  %p971_p8 = scmp.lt.s32.totalorder %s969_s12, %s962_s8 }
  0x82   : > { %p966_p7 = pneg %p965_p11  ;;  %p972_p4 = por %p971_p8, %p970_p1 }
  0x84   : > { %p973_p6 = pnand %p972_p4, %p966_p7 }
  0x86   : > { %976 = shalt.err (!%p973_p6)
}
  0x87   : > { %783 = dma.hbm_to_vmem [thread:$0]  (!%p1259_p10), %s1268_s10, 32, %s263_s29, %s251_s9  }
  0x88   : > { %p1437_p2 = scmp.ne.s32.totalorder %s1429_s28, 0 }
  0x89   : > { %s1319_s3 = sand.u32 (!%p1437_p2), 1, %s1055_s19   ;;  %p1438_p8 = scmp.ne.s32.totalorder (!%p1437_p2), %s1427_s26, 0 }
  0x8a   : > { %271 = sbr.rel (%p1437_p2) target bundleno = 897 (0x381), region = 40  ;;  %s1322_s7 = sshll.u32 (!%p1437_p2), %s1319_s3, 1 }
  0x8b   : > { %s274_s13 = scalar_lea.sflag (!%p1437_p2), [#allocation5], %s1319_s3  ;;  %s277_s15 = scalar_lea.vmem (!%p1437_p2), [#allocation4], %s1322_s7 }
  0x91   : > { %1030 = dma.done.wait (%p1438_p8), %s274_s13, 32  }
  0x92   : > { %1032 = vsyncadd (%p1438_p8), %s274_s13, 4294967264  ;;  %s282_s28 = sand.u32 1, %s1148_s24   ;;  %s286_s10 = scalar_lea.vmem [#allocation7], %s1322_s7 }
  0x93   : > { %s283_s16 = scalar_lea.sflag [#allocation8], %s282_s28 }
  0x94   : > { %1034 = dma.done.wait (%p1438_p8), %s283_s16, 32  }
  0x95   : > { %1036 = vsyncadd (%p1438_p8), %s283_s16, 4294967264  ;;  %p1439_p10 = scmp.eq.s32.totalorder %s1148_s24, 0 }
  0x97   : > { %1038 = dma.done.wait (%p1439_p10), [#allocation8], 512   ;;  %p1440_p3 = pmov %p1439_p10 }
  0x99   : > { %1040 = vsyncadd (%p1440_p3), [#allocation8], 4294966784  ;;  %p1441_p13 = pmov %p1440_p3 }
  0x9a   : > { %p1442_p0 = pmov %p1440_p3 }
  0x9b   : > { %1042 = dma.done.wait (%p1441_p13), [#allocation11], 512  }
  0x9c   : > { %1044 = vsyncadd (%p1442_p0), [#allocation11], 4294966784  ;;  %s325_s29 = scalar_lea.vmem [#allocation12], %s1322_s7  ;;  %p703_p5 = scmp.ne.s32.totalorder %s1063_s21, 0 }
  0x9d   : > { %vm330_vm0 = vcmask (!%p703_p5), 254976   ;;  %v1079_v0 = vmov (!%p703_p5), 0.0  }
  0x9e   : > { %329 = sbr.rel (%p703_p5) target bundleno = 165 (0xa5), region = 60  ;;  %331 = vst.msk [vmem:[#allocation2] sm:$0x3] (!%p703_p5), %vm330_vm0, %v1079_v0  ;;  %332 = vst.msk [vmem:[#allocation3] sm:$0x3] (!%p703_p5), %vm330_vm0, %v1079_v0 }
  0xa5 PF: > { %v339_v1 = vld [vmem:[#allocation10] sm:$0xff]  ;;  %v340_v2 = vld [vmem:[#allocation10 + $0x8] sm:$0xff]  ;;  %v1080_v4 = vmov 0.0|0.0   ;;  %v341_v7 = vld [vmem:[#allocation10 + $0x10] sm:$0xff]  ;;  %vm1081_vm1 = vmmov 0   ;;  %v1082_v12 = vmov 0.0  }
  0xa6   : > { %v334_v3 = vld [vmem:[#allocation9] sm:$0xff]  ;;  %744 = vmatprep.subr.bf16.mxu0 %v1080_v4  ;;  %750 = vmatprep.subr.bf16.mxu1 %v1080_v4  ;;  %v745_v5 = vpack.c.bf16 %v340_v2, %v339_v1  ;;  %v335_v6 = vld [vmem:[#allocation9 + $0x8] sm:$0xff]  ;;  %v342_v8 = vld [vmem:[#allocation10 + $0x18] sm:$0xff]  ;;  %vm343_vm2 = vcmask 261120   ;;  %s1083_s9 = smov 64   ;;  %s1084_s11 = smov 32  }
  0xa7   : > { %v751_v9 = vpack.c.bf16 %v335_v6, %v334_v3  ;;  %v336_v10 = vld [vmem:[#allocation9 + $0x10] sm:$0xff]  ;;  %v337_v11 = vld [vmem:[#allocation9 + $0x18] sm:$0xff]  ;;  %730 = vmatprep.mubr.msk.f32.mxu0 %vm1081_vm1, %v1082_v12  ;;  %741 = vmatprep.mubr.msk.f32.mxu1 %vm1081_vm1, %v1082_v12  ;;  %v748_v13 = vpack.c.bf16 %v342_v8, %v341_v7  ;;  %s1085_s2 = smov 96   ;;  %vm531_vm3 = vcmask 254976   ;;  %s709_s17 = sshll.u32 %s1063_s21, 5 }
  0xa8   : > { %746 = vmatpush3.bf16.msra.mxu0 %v745_v5  ;;  %v754_v14 = vpack.c.bf16 %v337_v11, %v336_v10  ;;  %v338_v15 = vld [vmem:[#allocation2] sm:$0x3]  ;;  %v333_v16 = vld [vmem:[%s286_s10] sm:$0x3]  ;;  %v505_v25 = vld [vmem:[#allocation3] sm:$0x3]  ;;  %s1360_s30 = scalar_lea.hbm %s1417_s5, %s709_s17 }
  0xa9   : > { %752 = vmatpush3.bf16.msra.mxu1 %v751_v9  ;;  %747 = vmatprep.subr.bf16.mxu0 %v1080_v4  ;;  %v706_v19 = vld [vmem:[%s1416_s4] ss:$0 sm:$0xff]  ;;  %v538_v26 = vld [vmem:[%s277_s15] sm:$0x3]  ;;  %s564_s22 = sshll.u32 %s325_s29, 4  ;;  %s550_s12 = scalar_lea.sflag [#allocation6], %s1319_s3  ;;  %s1362_s22 = int_to_ptr.vmem [resolvable:$true] %s564_s22 }
  0xaa   : > { %753 = vmatprep.subr.bf16.mxu1 %v1080_v4  ;;  %s977_s13 = scalar_lea.vmem %s1362_s22, 32  ;;  %p1443_p12 = scmp.ne.s32.totalorder %s1435_s6, 0 }
  0xab   : > { %p978_p9 = scmp.ne.s32.totalorder %s1362_s22, %s977_s13  ;;  %s1086_s21 = smov [#allocation12]  }
  0xac   : > { %749 = vmatpush3.bf16.msra.mxu0 %v748_v13  ;;  %s981_s15 = sshll.u32 %s1086_s21, 4  ;;  %s982_s15 = int_to_ptr.vmem [resolvable:$false] %s981_s15 }
  0xad   : > { %755 = vmatpush3.bf16.msra.mxu1 %v754_v14  ;;  %p979_p11 = pnand %p978_p9, %p1443_p12  ;;  %s983_s28 = scalar_lea.vmem %s982_s15, 64 }
  0xae   : > { %p984_p1 = scmp.lt.s32.totalorder %s1362_s22, %s982_s15  ;;  %p985_p4 = scmp.lt.s32.totalorder %s983_s28, %s977_s13 }
  0xaf   : > { %731 = vmatmul.mubr.msk.f32.vlgmr.msra.gmra.mrb[0].mxu0 %vm343_vm2, %v338_v15  ;;  %p980_p7 = pneg %p979_p11 }
  0xb0   : > { %742 = vmatmul.mubr.msk.f32.vlgmr.msra.gmra.mrb[0].mxu1 %vm343_vm2, %v333_v16  ;;  %p986_p6 = por %p985_p4, %p984_p1 }
  0xb2   : > { %p987_p2 = pnand %p986_p6, %p980_p7 }
 0x182   : > { %v413_v17 = vpop.f32.mrb[0].mxu0 }
 0x183   : > { %v486_v18 = vpop.f32.mrb[0].mxu1  ;;  %v732_v20 = vpop.f32.mrb[1].mxu0 }
 0x184   : > { %v487_v21 = vadd.f32 %v486_v18, %v413_v17  ;;  %v743_v22 = vpop.f32.mrb[1].mxu1 }
 0x186   : > { %v497_v23 = vadd.f32 %v706_v19, %v487_v21 }
 0x188   : > { %853 = vtanh.f32 %v497_v23  ;;  %v707_v27 = vmul.f32 -1.442695, %v497_v23 }
 0x18a   : > { %855 = vpow2.f32 %v707_v27 }
 0x192   : > { %v854_v24 = vpop.eup %853 }
 0x193   : > { %512 = vrot.lane.b32.xlu0 %v854_v24, %s1083_s9 }
 0x194   : > { %v856_v28 = vpop.eup %855 }
 0x195   : > { %v501_v29 = vadd.f32 1.0, %v856_v28 }
 0x197   : > { %507 = vrot.lane.b32.xlu0 %v505_v25, %s1084_s11  ;;  %857 = vrcp.f32 %v501_v29 }
 0x19b   : > { %540 = vrot.lane.b32.xlu0 %v538_v26, %s1085_s2 }
 0x1a1   : > { %v858_v30 = vpop.eup %857 }
 0x205   : > { %v513_v31 = vpop.permute.xlu0 %512 }
 0x206   : > { %v515_v32 = vmul.f32 %v858_v30, %v513_v31 }
 0x208   : > { %517 = vrot.lane.b32.xlu1 %v515_v32, %s1084_s11 }
 0x209   : > { %v508_v33 = vpop.permute.xlu0 %507 }
 0x20a   : > { %v510_v34 = vmul.f32 %v858_v30, %v508_v33 }
 0x20d   : > { %v541_v38 = vpop.permute.xlu0 %540 }
 0x27a   : > { %v518_v35 = vpop.permute.xlu1 %517 }
 0x27b   : > { %v520_v36 = vadd.f32 %v518_v35, %v510_v34 }
 0x27d   : > { %859 = vtanh.f32 %v520_v36  ;;  %528 = vrot.lane.b32.xlu0 %v520_v36, %s1085_s2 }
 0x287   : > { %v860_v37 = vpop.eup %859 }
 0x288   : > { %523 = vrot.lane.b32.xlu1 %v860_v37, %s1083_s9 }
 0x2ef   : > { %v529_v39 = vpop.permute.xlu0 %528 }
 0x2f0   : > { %532 = vst.msk [vmem:[#allocation3] sm:$0x3] %vm531_vm3, %v529_v39 }
 0x2fa   : > { %v524_v40 = vpop.permute.xlu1 %523 }
 0x2fb   : > { %v526_v41 = vmul.f32 %v858_v30, %v524_v40 }
 0x2fd   : > { %v543_v42 = vadd.f32 %v541_v38, %v526_v41 }
 0x2ff   : > { %545 = vrot.lane.b32.xlu1 %v543_v42, %s1084_s11 }
 0x303   : > { %534 = vrot.lane.b32.xlu1 %v526_v41, %s1084_s11 }
 0x371   : > { %v546_v43 = vpop.permute.xlu1 %545 }
 0x372   : > { %548 = vst.msk [vmem:[%s325_s29] sm:$0x3] %vm531_vm3, %v546_v43 }
 0x373   : > { %990 = shalt.err (!%p987_p2)
}
 0x374   : > { %s991_s3 = scalar_lea.hbm %s1360_s30, 32  ;;  %s995_s10 = scalar_lea.hbm %s1417_s5, 256 }
 0x375   : > { %p992_p8 = scmp.ne.s32.totalorder %s1360_s30, %s991_s3  ;;  %p996_p13 = scmp.lt.u32.totalorder %s1360_s30, %s1417_s5 }
 0x376   : > { %p997_p0 = scmp.lt.u32.totalorder %s995_s10, %s991_s3  ;;  %p999_p9 = scmp.lt.u32.totalorder %s991_s3, %s1360_s30 }
 0x377   : > { %p993_p10 = pnand %p992_p8, %p1443_p12 }
 0x378   : > { %p998_p5 = por %p997_p0, %p996_p13 }
 0x379   : > { %p994_p3 = pneg %p993_p10 }
 0x37a   : > { %p1000_p11 = por %p999_p9, %p998_p5 }
 0x37c   : > { %p1001_p7 = pnand %p1000_p11, %p994_p3 }
 0x37e   : > { %1004 = shalt.err (!%p1001_p7)
}
 0x37f   : > { %768 = dma.vmem_to_hbm [thread:$0]  (%p1443_p12), %s1362_s22, 32, %s1360_s30, %s550_s12   ;;  %v535_v44 = vpop.permute.xlu1 %534 }
 0x380   : > { %537 = vst.msk [vmem:[#allocation2] sm:$0x3] %vm531_vm3, %v535_v44 }
 0x381 PF: > { %p793_p1 = scmp.ge.s32.totalorder %s1071_s23, 2  ;;  %s576_s26 = sand.u32 1, %s1051_s18  }
 0x382   : > { %p1444_p4 = scmp.ne.s32.totalorder %s1428_s27, 0  ;;  %s577_s9 = scalar_lea.sflag [#allocation6], %s576_s26 }
 0x384   : > { %p785_p6 = pnand %p793_p1, %p1444_p4 }
 0x386   : > { %1046 = dma.done.wait (!%p785_p6), %s577_s9, 32  }
 0x387   : > { %1048 = vsyncadd (!%p785_p6), %s577_s9, 4294967264  ;;  %s25_s23 = sadd.s32 1, %s1071_s23   ;;  %s1445_s21 = sld [smem:[#allocation18_spill]] }
 0x388   : > { %p22_p2 = scmp.ge.s32.totalorder %s25_s23, 10   ;;  %s1446_s22 = sld [smem:[#allocation19_spill]] }
 0x389   : > { %s1447_s18 = smov %s1055_s19  ;;  %s1448_s19 = smov %s1059_s20 }
 0x38a   : > { %s1449_s20 = smov %s1249_s25  ;;  %24 = sbr.rel (!%p22_p2) target bundleno = 12 (0xc), region = 110 }
 0x391   :  { %582 = vsyncpa [#allocation5], 1 }
 0x392   :  { %584 = vsyncpa [#allocation5 + $0x1], 1 }
 0x393   :  { %585 = vsyncpa [#allocation8], 1 }
 0x394   :  { %587 = vsyncpa [#allocation8 + $0x1], 1 }
 0x395   :  { %588 = vsyncpa [#allocation11], 1 }
 0x396   :  { %589 = vsyncpa [#allocation6], 1 }
 0x397   :  { %591 = vsyncpa [#allocation6 + $0x1], 1 }

</bundles_post_ra>
